<compile_context>
chip_gen: v7x
topology: tpu7x:2x2x1
jax: 0.10.0
libtpu: 0.0.40
codegen_flags: <defaults>
</compile_context>

<pallas_src>
import numpy as np
import jax
import jax.numpy as jnp
from jax.experimental import pallas as pl
from jax.experimental.pallas import tpu as pltpu


def _nls_kernel(x_ref, c_ref, o_ref):
    """One batch chunk per grid step.

    x_ref : (Bc*N, 2N) f32 — rows of Ein^T per batch element, lanes = [re | im]
    c_ref : (2N, 2N)   f32 — real block form of right-mult by M^T:
                             [[MT.r, MT.i], [-MT.i, MT.r]]
    o_ref : (Bc*N, 2N) f32 — rows of Eout = M @ Ein @ M^T, lanes = [re | im]
    """
    rows, two_n = x_ref.shape
    n = two_n // 2
    bc = rows // n                       # static python int
    c = c_ref[...]

    # Stage 1: U = Ein^T @ M^T   (one wide MXU matmul for the whole chunk,
    # constant on the RHS; the 2Nx2N block form does the complex combine).
    u = jnp.dot(x_ref[...], c, preferred_element_type=jnp.float32)

    # Middle transpose (per batch element, XLU slot): V = U^T = M @ Ein.
    vparts = []
    for b in range(bc):                  # bc is small & static -> unrolled
        ub = u[b * n:(b + 1) * n, :]
        vparts.append(jnp.concatenate([ub[:, :n].T, ub[:, n:].T], axis=-1))
    v = vparts[0] if bc == 1 else jnp.concatenate(vparts, axis=0)

    # Stage 2: Eout = V @ M^T = M @ Ein @ M^T  (second wide matmul, same RHS).
    o_ref[...] = jnp.dot(v, c, preferred_element_type=jnp.float32)


def init_nls_prop(wavelength, dx, distance, N, padding=0.5, background_index=1.0):
    """Module __init__: build the folded propagator constant (deterministic)."""
    k = 2.0 * background_index * np.pi / wavelength
    Np = int((1 + 2 * padding) * N)
    pad = int(padding * N)

    kx_max = 0.5 / abs(dx)
    kx = 2.0 * np.pi * np.linspace(-kx_max, kx_max, Np)
    a = distance / k / 2.0

    # Separable transfer function: H[i, j] = h[i] * h[j],  h = exp(i a kx^2).
    h = np.exp(1j * a * kx ** 2)

    # Centered 1-D DFT matrices built by acting on the identity (exact for any Np):
    #   ft2(E)  = A @ E @ A^T ,  ift2(X) = Binv @ X @ Binv^T
    I = np.eye(Np)
    A = np.fft.fftshift(np.fft.fft(np.fft.fftshift(I, axes=0), axis=0), axes=0)
    Binv = np.fft.ifftshift(np.fft.ifft(np.fft.ifftshift(I, axes=0), axis=0), axes=0)

    # Fold H, zero-pad and crop into one N x N complex matrix M.
    M_full = Binv @ np.diag(h) @ A
    M = np.ascontiguousarray(M_full[pad:pad + N, pad:pad + N]).astype(np.complex64)

    # Real 2Nx2N block form of "right-multiply by M^T" on [re | im] lane-packed rows.
    MT = M.T
    Cmat = np.block([[MT.real, MT.imag],
                     [-MT.imag, MT.real]]).astype(np.float32)

    # Full 2-D transfer function kept only for the reference check below.
    Kx, Ky = np.meshgrid(kx, kx, indexing="ij")
    H = np.exp(1j * a * (Kx ** 2 + Ky ** 2)).astype(np.complex64)

    return dict(padding=padding, N=N, Np=Np, pad=pad,
                Cmat=jnp.asarray(Cmat), H=jnp.asarray(H))


def _pick_bc(btot, n, vmem_block_budget=8 * 1024 * 1024):
    """Batch-chunk size: fits a VMEM budget, keeps >=2 grid steps when possible."""
    if n % 8 != 0:
        return btot                      # full-array single block is always legal
    bytes_per_elem = 2 * (n * 2 * n * 4) * 2   # (in + out) block, double-buffered
    cap = max(1, vmem_block_budget // bytes_per_elem)
    if btot > 1:
        cap = min(cap, max(1, btot // 2))      # pipelining + 2 TCs on v7x
    cap = min(cap, 8)                          # bound in-kernel unrolling
    bc = 1
    for d in range(1, int(cap) + 1):
        if btot % d == 0:
            bc = d
    return bc


def nls_prop_forward(field, p):
    """field: complex64, shape (..., N, N) — e.g. (B, C, N, N) or (N, N)."""
    n = p["N"]
    lead = field.shape[:-2]
    assert field.shape[-2] == field.shape[-1] == n, \
        "square field matching the propagator built in init"
    btot = int(np.prod(lead)) if lead else 1
    x = field.reshape(btot, n, n)

    # Pack: rows of Ein^T with [real | imag] along lanes (transpose + split +
    # concat fuse into a single XLA copy around the pallas_call).
    xt = jnp.swapaxes(x, -1, -2)
    packed = jnp.concatenate([jnp.real(xt), jnp.imag(xt)], axis=-1)
    packed = packed.astype(jnp.float32).reshape(btot * n, 2 * n)

    bc = _pick_bc(btot, n)
    grid = (btot // bc,)

    flops = 2 * (2 * (btot * n) * (2 * n) * (2 * n))          # two real matmuls
    bytes_accessed = 2 * (btot * n * 2 * n) * 4 + (2 * n) * (2 * n) * 4

    out = pl.pallas_call(
        _nls_kernel,
        out_shape=jax.ShapeDtypeStruct((btot * n, 2 * n), jnp.float32),
        grid_spec=pltpu.PrefetchScalarGridSpec(
            num_scalar_prefetch=0,
            grid=grid,
            in_specs=[
                pl.BlockSpec((bc * n, 2 * n), lambda b: (b, 0)),   # field chunk
                pl.BlockSpec((2 * n, 2 * n), lambda b: (0, 0)),    # constant, fetched once
            ],
            out_specs=pl.BlockSpec((bc * n, 2 * n), lambda b: (b, 0)),
        ),
        compiler_params=pltpu.CompilerParams(
            dimension_semantics=("parallel",),
            vmem_limit_bytes=32 * 1024 * 1024,
        ),
        cost_estimate=pl.CostEstimate(
            flops=flops, transcendentals=0, bytes_accessed=bytes_accessed),
    )(packed, p["Cmat"])

    out = out.reshape(btot, n, 2 * n)
    eout = (out[..., :n] + 1j * out[..., n:]).astype(jnp.complex64)
    return eout.reshape(lead + (n, n))


if __name__ == "__main__":
    # physical / simulation parameters
    wavelength = 1.55e-6
    dx = 1.0e-6
    distance = 50.0e-6
    N = 16
    padding = 0.5
    B, C = 2, 2

    p = init_nls_prop(wavelength, dx, distance, N, padding=padding)

    key = jax.random.PRNGKey(0)
    kr, ki = jax.random.split(key)
    field = (jax.random.normal(kr, (B, C, N, N), dtype=jnp.float32)
             + 1j * jax.random.normal(ki, (B, C, N, N), dtype=jnp.float32)
             ).astype(jnp.complex64)

    out = nls_prop_forward(field, p)
    out = jax.block_until_ready(out)

    # pure-JAX FFT reference (same centered ft2/ift2 convention as the torch code)
    def ft2(xx):
        return jnp.fft.fftshift(
            jnp.fft.fft2(jnp.fft.fftshift(xx, axes=(-2, -1)), axes=(-2, -1)),
            axes=(-2, -1))

    def ift2(xx):
        return jnp.fft.ifftshift(
            jnp.fft.ifft2(jnp.fft.ifftshift(xx, axes=(-2, -1)), axes=(-2, -1)),
            axes=(-2, -1))

    pad = p["pad"]
    Ein_ref = jnp.pad(field, ((0, 0), (0, 0), (pad, pad), (pad, pad)))
    ref = ift2(ft2(Ein_ref) * p["H"][None, None])[..., pad:pad + N, pad:pad + N]

    assert out.shape == (B, C, N, N) and out.dtype == jnp.complex64
    np.testing.assert_allclose(np.asarray(out), np.asarray(ref), atol=5e-2, rtol=5e-2)
    print("KERNEL_OK")
</pallas_src>

<mosaic_0001>
module attributes {stable_mosaic.version = 11 : i64} {
  func.func @_nls_kernel(%arg0: i32, %arg1: memref<32x32xf32, #tpu.memory_space<vmem>>, %arg2: memref<32x32xf32, #tpu.memory_space<vmem>>, %arg3: memref<32x32xf32, #tpu.memory_space<vmem>>) attributes {dimension_semantics = [#tpu.dimension_semantics<parallel>], iteration_bounds = array<i64: 2>, scalar_prefetch = 0 : i64, scratch_operands = 0 : i64, tpu.core_type = #tpu.core_type<tc>, window_params = [{transform_indices = @transform_0, window_bounds = array<i64: 32, 32>}, {pipeline_mode = #tpu.pipeline_mode<synchronous>, transform_indices = @transform_1, window_bounds = array<i64: 32, 32>}, {transform_indices = @transform_2, window_bounds = array<i64: 32, 32>}]} {
    %c0 = arith.constant 0 : index
    %c0_0 = arith.constant 0 : index
    %0 = vector.load %arg2[%c0, %c0_0] : memref<32x32xf32, #tpu.memory_space<vmem>>, vector<32x32xf32>
    %c0_1 = arith.constant 0 : index
    %c0_2 = arith.constant 0 : index
    %1 = vector.load %arg1[%c0_1, %c0_2] : memref<32x32xf32, #tpu.memory_space<vmem>>, vector<32x32xf32>
    %cst = arith.constant dense<0.000000e+00> : vector<32x32xf32>
    %2 = tpu.matmul %1, %0, %cst {dimension_numbers = #tpu.dot_dimension_numbers<[1], [0], [0], [1], [0, 0, 1, 1], [], []>} : vector<32x32xf32>, vector<32x32xf32>, vector<32x32xf32> -> vector<32x32xf32>
    %3 = vector.extract_strided_slice %2 {offsets = [0, 0], sizes = [16, 32], strides = [1, 1]} : vector<32x32xf32> to vector<16x32xf32>
    %4 = vector.extract_strided_slice %3 {offsets = [0, 0], sizes = [16, 16], strides = [1, 1]} : vector<16x32xf32> to vector<16x16xf32>
    %5 = tpu.transpose %4, [1, 0] : vector<16x16xf32> -> vector<16x16xf32>
    %6 = vector.extract_strided_slice %3 {offsets = [0, 16], sizes = [16, 16], strides = [1, 1]} : vector<16x32xf32> to vector<16x16xf32>
    %7 = tpu.transpose %6, [1, 0] : vector<16x16xf32> -> vector<16x16xf32>
    %8 = tpu.concatenate %5, %7 in 1 : vector<16x16xf32>, vector<16x16xf32> -> vector<16x32xf32>
    %9 = vector.extract_strided_slice %2 {offsets = [16, 0], sizes = [16, 32], strides = [1, 1]} : vector<32x32xf32> to vector<16x32xf32>
    %10 = vector.extract_strided_slice %9 {offsets = [0, 0], sizes = [16, 16], strides = [1, 1]} : vector<16x32xf32> to vector<16x16xf32>
    %11 = tpu.transpose %10, [1, 0] : vector<16x16xf32> -> vector<16x16xf32>
    %12 = vector.extract_strided_slice %9 {offsets = [0, 16], sizes = [16, 16], strides = [1, 1]} : vector<16x32xf32> to vector<16x16xf32>
    %13 = tpu.transpose %12, [1, 0] : vector<16x16xf32> -> vector<16x16xf32>
    %14 = tpu.concatenate %11, %13 in 1 : vector<16x16xf32>, vector<16x16xf32> -> vector<16x32xf32>
    %15 = tpu.concatenate %8, %14 in 0 : vector<16x32xf32>, vector<16x32xf32> -> vector<32x32xf32>
    %cst_3 = arith.constant dense<0.000000e+00> : vector<32x32xf32>
    %16 = tpu.matmul %15, %0, %cst_3 {dimension_numbers = #tpu.dot_dimension_numbers<[1], [0], [0], [1], [0, 0, 1, 1], [], []>} : vector<32x32xf32>, vector<32x32xf32>, vector<32x32xf32> -> vector<32x32xf32>
    %c0_4 = arith.constant 0 : index
    %c0_5 = arith.constant 0 : index
    %17 = vector.load %arg3[%c0_4, %c0_5] : memref<32x32xf32, #tpu.memory_space<vmem>>, vector<32x32xf32>
    tpu.vector_store %arg3[%c0_4, %c0_5], %16 {strides = array<i32>} : memref<32x32xf32, #tpu.memory_space<vmem>>, vector<32x32xf32>,
    return
  }
  func.func @transform_0(%arg0: i32) -> (i32, i32) {
    %c0_i32 = arith.constant 0 : i32
    %c0_i32_0 = arith.constant 0 : i32
    return %arg0, %c0_i32 : i32, i32
  }
  func.func @transform_1(%arg0: i32) -> (i32, i32) {
    %c0_i32 = arith.constant 0 : i32
    %c0_i32_0 = arith.constant 0 : i32
    %c0_i32_1 = arith.constant 0 : i32
    return %c0_i32, %c0_i32_0 : i32, i32
  }
  func.func @transform_2(%arg0: i32) -> (i32, i32) {
    %c0_i32 = arith.constant 0 : i32
    %c0_i32_0 = arith.constant 0 : i32
    return %arg0, %c0_i32 : i32, i32
  }
}

</mosaic_0001>

<bundles_post_ra>
// kernel: tpu_custom_call.1
= control target key start
LH: loop header
LB: loop body
LE: loop exit
PB: predicated region body
PF: predicated region fallthrough
CT: control target
= control target key end

     0   :  { %s690_s9 = smov 0   ;;  %s738_s0 = inlined_call_operand.vmem [shape: f32[64,32], index: 0, kind: input, shape index: {}]   ;;  %s739_s1 = inlined_call_operand.vmem [shape: f32[32,32], index: 1, kind: input, shape index: {}]   ;;  %s740_s2 = inlined_call_operand.vmem [shape: f32[64,32], index: 2, kind: output, shape index: {}]  }
   0x1 LB: > { %s575_s10 = sadd.s32 4294967295, %s671_s9   ;;  %p579_p0 = scmp.ge.s32.totalorder %s671_s9, 1  ;;  %s671_s9 = sphi %s690_s9, %s12_s9  }
   0x2   : > { %p113_p1 = scmp.lt.s32.totalorder %s671_s9, 3 }
   0x4   : > { %p114_p2 = pnand %p579_p0, %p113_p1 }
   0x5   : > { %v147_v0 = vld [vmem:[%s739_s1] sm:$0xff] (!%p114_p2)  ;;  %v148_v1 = vld [vmem:[%s739_s1 + $0x8] sm:$0xff] (!%p114_p2)  ;;  %v149_v2 = vld [vmem:[%s739_s1 + $0x10] sm:$0xff] (!%p114_p2)  ;;  %s580_s17 = sshll.u32 (!%p114_p2), %s575_s10, 2  ;;  %vm155_vm0 = vcmask (!%p114_p2), 261120   ;;  %s673_s24 = smov (!%p114_p2), 112  }
   0x6   : > { %117 = sbr.rel (%p114_p2) target bundleno = 875 (0x36b), region = 28  ;;  %v638_v3 = vpack.c.bf16 (!%p114_p2), %v148_v1, %v147_v0  ;;  %v150_v4 = vld [vmem:[%s739_s1 + $0x18] sm:$0xff] (!%p114_p2)  ;;  %p136_p3 = scmp.lt.s32.totalorder (!%p114_p2), %s580_s17, 7  ;;  %vm333_vm1 = vcmask (!%p114_p2), 130048  }
   0x7   : > { %v642_v5 = vpack.c.bf16 (!%p114_p2), %v150_v4, %v149_v2  ;;  %s674_s25 = smov (!%p114_p2), 16  }
   0x8   : > { %639 = vmatprep.subr.bf16.mxu0 (!%p114_p2), %v638_v3  ;;  %647 = vmatprep.subr.bf16.mxu1 (!%p114_p2), %v638_v3 }
   0x9   : > { %641 = vmatpush3.bf16.msra.mxu0 (!%p114_p2), %v638_v3  ;;  %649 = vmatpush3.bf16.msra.mxu1 (!%p114_p2), %v638_v3 }
   0xa   : > { %643 = vmatprep.subr.bf16.mxu0 (!%p114_p2), %v642_v5  ;;  %651 = vmatprep.subr.bf16.mxu1 (!%p114_p2), %v642_v5 }
   0xd   : > { %s742_s17 = smov (!%p136_p3, %s580_s17), 7  ;;  %645 = vmatpush3.bf16.msra.mxu0 %v642_v5  ;;  %653 = vmatpush3.bf16.msra.mxu1 %v642_v5 }
   0xe   : > { %s581_s20 = sshll.u32 %s742_s17, 3 }
   0xf   : > { %s139_s23 = scalar_lea.vmem %s738_s0, %s581_s20  ;;  %s145_s28 = scalar_lea.vmem %s740_s2, %s581_s20 }
  0x10   : > { %v151_v6 = vld [vmem:[%s139_s23] sm:$0xff]  ;;  %v152_v7 = vld [vmem:[%s139_s23 + $0x8] sm:$0xff]  ;;  %v153_v8 = vld [vmem:[%s139_s23 + $0x10] sm:$0xff] }
  0x11   : > { %618 = vmatprep.mubr.msk.f32.mxu0 %vm155_vm0, %v151_v6  ;;  %v154_v9 = vld [vmem:[%s139_s23 + $0x18] sm:$0xff] }
  0x12   : > { %619 = vmatmul.mubr.msk.f32.vlgmr.msra.gmra.mrb[0].mxu0 %vm155_vm0, %v152_v7 }
  0x13   : > { %621 = vmatprep.mubr.msk.f32.mxu0 %vm155_vm0, %v153_v8 }
  0x16   : > { %622 = vmatmul.mubr.msk.f32.gmra.mrb[2].mxu0 %vm155_vm0, %v154_v9 }
  0xe5   : > { %v620_v10 = vpop.f32.mrb[0].mxu0 }
  0xe6   : > { %v234_v11 = vpop.f32.mrb[1].mxu0 }
  0xe7   : > { %287 = vrot.lane.b32.xlu0 %v234_v11, %s673_s24 }
  0xe9   : > { %v623_v12 = vpop.f32.mrb[2].mxu0 }
  0xea   : > { %372 = vrot.lane.b32.xlu1 %v623_v12, %s673_s24  ;;  %v244_v13 = vpop.f32.mrb[3].mxu0 }
  0xeb   : > { %289 = vrot.lane.b32.xlu0 %v620_v10, %s673_s24 }
  0xee   : > { %370 = vrot.lane.b32.xlu1 %v244_v13, %s673_s24 }
 0x159   : > { %v288_v14 = vpop.permute.xlu0 %287 }
 0x15a   : > { %293 = vxpose.xlu0.b32.start [1/2] (short) (narrow) %v288_v14, 16 }
 0x15c   : > { %v373_v15 = vpop.permute.xlu1 %372 }
 0x15d   : > { %v290_v16 = vpop.permute.xlu0 %289 }
 0x15e   : > { %294 = vxpose.xlu0.b32.end [2/2] (short) (narrow) %v290_v16, 16 }
 0x160   : > { %v371_v17 = vpop.permute.xlu1 %370 }
 0x161   : > { %376 = vxpose.xlu1.b32.start [1/2] (short) (narrow) %v371_v17, 16 }
 0x165   : > { %377 = vxpose.xlu1.b32.end [2/2] (short) (narrow) %v373_v15, 16 }
 0x1da   : > { %v309_v18 = vpop.trf.xlu0 }
 0x1db   : > { %327 = vrot.lane.b32.xlu0 %v309_v18, %s674_s25 }
 0x1de   : > { %v310_v19 = vpop.trf.xlu0 }
 0x1df   : > { %329 = vrot.lane.b32.xlu1 %v310_v19, %s674_s25 }
 0x1e1   : > { %v392_v20 = vpop.trf.xlu1 }
 0x1e2   : > { %410 = vrot.lane.b32.xlu0 %v392_v20, %s674_s25 }
 0x1e5   : > { %v393_v21 = vpop.trf.xlu1 }
 0x1e6   : > { %412 = vrot.lane.b32.xlu1 %v393_v21, %s674_s25 }
 0x200   : > { %253 = vxpose.xlu0.b32.start [1/2] (short) (narrow) %v234_v11, 16 }
 0x204   : > { %254 = vxpose.xlu0.b32.end [2/2] (short) (narrow) %v620_v10, 16 }
 0x20f   : > { %336 = vxpose.xlu1.b32.start [1/2] (short) (narrow) %v244_v13, 16 }
 0x213   : > { %337 = vxpose.xlu1.b32.end [2/2] (short) (narrow) %v623_v12, 16 }
 0x24d   : > { %v328_v22 = vpop.permute.xlu0 %327 }
 0x251   : > { %v330_v26 = vpop.permute.xlu1 %329 }
 0x254   : > { %v411_v23 = vpop.permute.xlu0 %410 }
 0x258   : > { %v413_v29 = vpop.permute.xlu1 %412 }
 0x280   : > { %v269_v24 = vpop.trf.xlu0 }
 0x281   : > { %v334_v25 = vsel %vm333_vm1, %v269_v24, %v328_v22 }
 0x282   : > { %632 = vmatprep.mubr.msk.f32.mxu1 %vm155_vm0, %v334_v25 }
 0x284   : > { %v270_v27 = vpop.trf.xlu0 }
 0x285   : > { %v335_v28 = vsel %vm333_vm1, %v270_v27, %v330_v26 }
 0x286   : > { %633 = vmatmul.mubr.msk.f32.vlgmr.msra.gmra.mrb[0].mxu1 %vm155_vm0, %v335_v28 }
 0x28f   : > { %v352_v30 = vpop.trf.xlu1 }
 0x290   : > { %v416_v31 = vsel %vm333_vm1, %v352_v30, %v411_v23 }
 0x291   : > { %635 = vmatprep.mubr.msk.f32.mxu1 %vm155_vm0, %v416_v31 }
 0x293   : > { %v353_v32 = vpop.trf.xlu1 }
 0x294   : > { %v417_v33 = vsel %vm333_vm1, %v353_v32, %v413_v29 }
 0x295   : > { %636 = vmatmul.mubr.msk.f32.gmra.mrb[2].mxu1 %vm155_vm0, %v417_v33 }
 0x359   : > { %v634_v34 = vpop.f32.mrb[0].mxu1 }
 0x35a   : > { %v496_v35 = vpop.f32.mrb[1].mxu1  ;;  %516 = vst.msk [vmem:[%s145_s28 + $0x8] sm:$0xff] %vm155_vm0, %v634_v34 }
 0x35b   : > { %515 = vst.msk [vmem:[%s145_s28] sm:$0xff] %vm155_vm0, %v496_v35 }
 0x368   : > { %v637_v36 = vpop.f32.mrb[2].mxu1 }
 0x369   : > { %v506_v37 = vpop.f32.mrb[3].mxu1  ;;  %518 = vst.msk [vmem:[%s145_s28 + $0x18] sm:$0xff] %vm155_vm0, %v637_v36 }
 0x36a   : > { %517 = vst.msk [vmem:[%s145_s28 + $0x10] sm:$0xff] %vm155_vm0, %v506_v37 }
 0x36b PF: > { %s12_s9 = sadd.s32 1, %s671_s9  }
 0x36c   : > { %p9_p4 = scmp.ge.s32.totalorder %s12_s9, 4  }
 0x36e   :  { %11 = sbr.rel (!%p9_p4) target bundleno = 1 (0x1), region = 58 }

</bundles_post_ra>
